<compile_context>
chip_gen: v7x
topology: tpu7x:2x2x1
jax: 0.10.0
libtpu: 0.0.40
codegen_flags: <defaults>
</compile_context>

<pallas_src>
import functools

import jax
import jax.numpy as jnp
from jax.experimental import pallas as pl
from jax.experimental.pallas import tpu as pltpu

BN_EPS = 1e-5


def _ceil8(v):
    return (v + 7) // 8 * 8


def _vmem_limit_bytes():
    """Scoped-VMEM limit: ~3/4 of physical VMEM, capped at 100 MiB.

    v5e/v6e (128 MiB) -> 96 MiB; v7x (64 MiB/TC) or unknown -> 48 MiB.
    """
    cap = 64 * 1024 * 1024
    try:
        info = pltpu.get_tpu_info()
        cap = int(getattr(info, "vmem_capacity_bytes", cap))
    except Exception:
        pass
    return min((cap * 3) // 4, 100 * 1024 * 1024)


def _pick_tile_hw(hw, bytes_per_pixel, budget_bytes):
    """Largest lane-dense (multiple-of-128) divisor of hw fitting the budget."""
    best = None
    for t in range(128, hw + 1, 128):
        if hw % t == 0 and t * bytes_per_pixel <= budget_bytes:
            best = t
    if best is None:
        # hw not 128-divisible (single full-extent tile) or budget too tight.
        best = hw if (hw < 128 or hw % 128 != 0) else 128
    return best


# --------------------------- fused single-pass ------------------------------

def _fused_kernel(x_ref, w1_ref, b1_ref, gamma_ref, beta_ref, w2_ref, b2_ref,
                  hidden_ref, out_ref,
                  hpre_scr, sum_scr, sumsq_scr, scale_scr, shift_scr, *, inv_m):
    phase = pl.program_id(0)
    i = pl.program_id(1)
    t = pl.program_id(2)
    n_t = pl.num_programs(2)
    idx = i * n_t + t            # tile slot in the resident h_pre scratch

    @pl.when(phase == 0)
    def _encode_and_stats():
        @pl.when(jnp.logical_and(i == 0, t == 0))
        def _init():
            sum_scr[...] = jnp.zeros_like(sum_scr)
            sumsq_scr[...] = jnp.zeros_like(sumsq_scr)

        h_pre = jnp.dot(w1_ref[...], x_ref[...],
                        preferred_element_type=jnp.float32) + b1_ref[...]
        hpre_scr[idx] = h_pre
        sum_scr[...] += jnp.sum(h_pre, axis=1, keepdims=True)
        sumsq_scr[...] += jnp.sum(h_pre * h_pre, axis=1, keepdims=True)

    @pl.when(phase == 1)
    def _normalize_and_decode():
        @pl.when(jnp.logical_and(i == 0, t == 0))
        def _finalize_stats():
            # TODO(synk): E[h^2]-mean^2 can cancel when |mean| >> std over very
            # large N*H*W; a shifted/Welford combine would be more robust.
            mean = sum_scr[...] * inv_m
            var = jnp.maximum(sumsq_scr[...] * inv_m - mean * mean, 0.0)
            scale = gamma_ref[...] * jax.lax.rsqrt(var + BN_EPS)
            scale_scr[...] = scale
            shift_scr[...] = beta_ref[...] - mean * scale

        hidden = hpre_scr[idx] * scale_scr[...] + shift_scr[...]
        hidden_ref[...] = hidden
        out_ref[...] = jnp.dot(w2_ref[...], hidden,
                               preferred_element_type=jnp.float32) + b2_ref[...]


# ---------------------------- two-pass fallback ------------------------------

def _stats_kernel(x_ref, w1_ref, b1_ref, sum_ref, sumsq_ref):
    # Output blocks are resident across the t axis (accumulator pattern).
    @pl.when(pl.program_id(1) == 0)
    def _init():
        sum_ref[...] = jnp.zeros_like(sum_ref)
        sumsq_ref[...] = jnp.zeros_like(sumsq_ref)

    h = jnp.dot(w1_ref[...], x_ref[...],
                preferred_element_type=jnp.float32) + b1_ref[...]
    sum_ref[...] += jnp.sum(h, axis=1, keepdims=True)
    sumsq_ref[...] += jnp.sum(h * h, axis=1, keepdims=True)


def _encode_decode_kernel(x_ref, w1s_ref, b1s_ref, weff_ref, beff_ref,
                          hidden_ref, out_ref):
    # BN already folded into the weights: two independent matmuls on x.
    x = x_ref[...]
    hidden_ref[...] = jnp.dot(w1s_ref[...], x,
                              preferred_element_type=jnp.float32) + b1s_ref[...]
    out_ref[...] = jnp.dot(weff_ref[...], x,
                           preferred_element_type=jnp.float32) + beff_ref[...]


# --------------------------------- wrapper -----------------------------------

def _autoencoder_forward(x_nchw, params, force_two_pass=False):
    """x_nchw: (N, C, H, W) float32. Returns (hidden, out) in NCHW."""
    w1, b1, gamma, beta, w2, b2 = params
    n, c, h, w = x_nchw.shape
    clat = w1.shape[0]
    hw = h * w
    m = n * hw

    vmem_limit = _vmem_limit_bytes()
    c_pad, clat_pad = _ceil8(c), _ceil8(clat)
    # per-pixel bytes of the pipelined tiles (x, hidden, out; double-buffered)
    per_pixel = 4 * 2 * (2 * c_pad + clat_pad)
    hpre_bytes = 4 * n * clat_pad * max(hw, 128)          # resident scratch
    fused = (not force_two_pass) and hpre_bytes <= (vmem_limit * 3) // 5
    tile_budget = max((vmem_limit * 4) // 5 - (hpre_bytes if fused else 0),
                      per_pixel * 128)
    tile_hw = _pick_tile_hw(hw, per_pixel, tile_budget)
    t_steps = hw // tile_hw

    x3 = x_nchw.reshape(n, c, hw)         # free reshape, no HBM transpose
    b1c = b1.reshape(clat, 1)
    b2c = b2.reshape(c, 1)

    if fused:
        const3 = lambda p, i, t: (0, 0)
        kernel = functools.partial(_fused_kernel, inv_m=1.0 / m)
        hidden3, out3 = pl.pallas_call(
            kernel,
            out_shape=(jax.ShapeDtypeStruct((n, clat, hw), jnp.float32),
                       jax.ShapeDtypeStruct((n, c, hw), jnp.float32)),
            grid=(2, n, t_steps),
            in_specs=[
                # x is fetched in phase 0 only; phase 1 pins the last phase-0
                # block index so the pipeline never re-fetches it.
                pl.BlockSpec((None, c, tile_hw),
                             lambda p, i, t: (i * (1 - p) + (n - 1) * p, 0,
                                              t * (1 - p) + (t_steps - 1) * p)),
                pl.BlockSpec((clat, c), const3),   # w1
                pl.BlockSpec((clat, 1), const3),   # b1
                pl.BlockSpec((clat, 1), const3),   # gamma
                pl.BlockSpec((clat, 1), const3),   # beta
                pl.BlockSpec((c, clat), const3),   # w2
                pl.BlockSpec((c, 1), const3),      # b2
            ],
            out_specs=(
                # Outputs advance only in phase 1; pinned at block (0,.,0) in
                # phase 0 so no uninitialized block is ever written back.
                pl.BlockSpec((None, clat, tile_hw),
                             lambda p, i, t: (i * p, 0, t * p)),
                pl.BlockSpec((None, c, tile_hw),
                             lambda p, i, t: (i * p, 0, t * p)),
            ),
            scratch_shapes=[
                pltpu.VMEM((n * t_steps, clat, tile_hw), jnp.float32),  # h_pre
                pltpu.VMEM((clat, 1), jnp.float32),   # sum
                pltpu.VMEM((clat, 1), jnp.float32),   # sum of squares
                pltpu.VMEM((clat, 1), jnp.float32),   # BN scale
                pltpu.VMEM((clat, 1), jnp.float32),   # BN shift
            ],
            compiler_params=pltpu.CompilerParams(
                dimension_semantics=("arbitrary", "arbitrary", "arbitrary"),
                vmem_limit_bytes=vmem_limit),
        )(x3, w1, b1c, gamma.reshape(clat, 1), beta.reshape(clat, 1), w2, b2c)
        return hidden3.reshape(n, clat, h, w), out3.reshape(n, c, h, w)

    # ---------------- two-pass fallback (h_pre does not fit VMEM) ----------------
    const2 = lambda i, t: (0, 0)

    psum, psumsq = pl.pallas_call(
        _stats_kernel,
        out_shape=(jax.ShapeDtypeStruct((n, clat, 1), jnp.float32),
                   jax.ShapeDtypeStruct((n, clat, 1), jnp.float32)),
        grid=(n, t_steps),
        in_specs=[
            pl.BlockSpec((None, c, tile_hw), lambda i, t: (i, 0, t)),
            pl.BlockSpec((clat, c), const2),
            pl.BlockSpec((clat, 1), const2),
        ],
        out_specs=(
            pl.BlockSpec((None, clat, 1), lambda i, t: (i, 0, 0)),
            pl.BlockSpec((None, clat, 1), lambda i, t: (i, 0, 0)),
        ),
        compiler_params=pltpu.CompilerParams(
            dimension_semantics=("parallel", "arbitrary"),
            vmem_limit_bytes=vmem_limit),
    )(x3, w1, b1c)

    # Tiny per-channel combine + BN folding into the conv weights (f32).
    s = jnp.sum(psum, axis=0)               # (Clat, 1)
    ss = jnp.sum(psumsq, axis=0)
    mean = s / m
    var = jnp.maximum(ss / m - mean * mean, 0.0)
    inv_std = jax.lax.rsqrt(var + BN_EPS)
    scale = gamma.reshape(clat, 1) * inv_std
    shift = beta.reshape(clat, 1) - mean * scale
    w1s = scale * w1                         # hidden = w1s @ x + b1s
    b1s = scale * b1c + shift
    w_eff = w2 @ w1s                         # out    = w_eff @ x + b_eff
    b_eff = w2 @ b1s + b2c

    hidden3, out3 = pl.pallas_call(
        _encode_decode_kernel,
        out_shape=(jax.ShapeDtypeStruct((n, clat, hw), jnp.float32),
                   jax.ShapeDtypeStruct((n, c, hw), jnp.float32)),
        grid=(n, t_steps),
        in_specs=[
            pl.BlockSpec((None, c, tile_hw), lambda i, t: (i, 0, t)),
            pl.BlockSpec((clat, c), const2),    # w1s
            pl.BlockSpec((clat, 1), const2),    # b1s
            pl.BlockSpec((c, c), const2),       # w_eff
            pl.BlockSpec((c, 1), const2),       # b_eff
        ],
        out_specs=(
            pl.BlockSpec((None, clat, tile_hw), lambda i, t: (i, 0, t)),
            pl.BlockSpec((None, c, tile_hw), lambda i, t: (i, 0, t)),
        ),
        compiler_params=pltpu.CompilerParams(
            dimension_semantics=("parallel", "parallel"),
            vmem_limit_bytes=vmem_limit),
    )(x3, w1s, b1s, w_eff, b_eff)

    return hidden3.reshape(n, clat, h, w), out3.reshape(n, c, h, w)


autoencoder_forward = jax.jit(_autoencoder_forward,
                              static_argnames=("force_two_pass",))


# ------------------------------ params / reference ---------------------------

def make_params(key, channels, latent_channels):
    k1, k2, k3, k4 = jax.random.split(key, 4)
    # Conv2d(channels, latent_channels, 1): weight (Clat, Cin), bias (Clat,)
    w1 = 0.1 * jax.random.normal(k1, (latent_channels, channels), jnp.float32)
    b1 = 0.1 * jax.random.normal(k2, (latent_channels,), jnp.float32)
    # BatchNorm2d(latent_channels): gamma=1, beta=0 at init
    gamma = jnp.ones((latent_channels,), jnp.float32)
    beta = jnp.zeros((latent_channels,), jnp.float32)
    # Conv2d(latent_channels, channels, 1): weight (Cin, Clat), bias (Cin,)
    w2 = 0.1 * jax.random.normal(k3, (channels, latent_channels), jnp.float32)
    b2 = 0.1 * jax.random.normal(k4, (channels,), jnp.float32)
    return (w1, b1, gamma, beta, w2, b2)


def reference_forward(x_nchw, params):
    """Pure-JAX reference matching PyTorch training-mode BatchNorm semantics."""
    w1, b1, gamma, beta, w2, b2 = params
    h_pre = jnp.einsum('nchw,oc->nohw', x_nchw, w1) + b1[None, :, None, None]
    mean = jnp.mean(h_pre, axis=(0, 2, 3), keepdims=True)
    var = jnp.mean((h_pre - mean) ** 2, axis=(0, 2, 3), keepdims=True)
    hidden = (h_pre - mean) * jax.lax.rsqrt(var + BN_EPS)
    hidden = hidden * gamma[None, :, None, None] + beta[None, :, None, None]
    out = jnp.einsum('nchw,oc->nohw', hidden, w2) + b2[None, :, None, None]
    return hidden, out


if __name__ == "__main__":
    # TODO(synk): BatchNorm2d running_mean/running_var buffer updates (training
    # side effect) are not modeled; forward uses batch statistics as in train().
    key = jax.random.PRNGKey(0)
    kx, kp = jax.random.split(key)

    N, C, H, W = 2, 4, 16, 16
    LATENT = 8

    x = jax.random.normal(kx, (N, C, H, W), jnp.float32)
    params = make_params(kp, C, LATENT)
    hidden_gold, out_gold = reference_forward(x, params)

    # Fused (h_pre VMEM-resident) path — the default at these shapes.
    hidden, out = autoencoder_forward(x, params)
    jax.block_until_ready((hidden, out))
    assert hidden.shape == (N, LATENT, H, W)
    assert out.shape == (N, C, H, W)
    assert jnp.allclose(hidden, hidden_gold, atol=5e-4, rtol=5e-4)
    assert jnp.allclose(out, out_gold, atol=5e-4, rtol=5e-4)

    # Two-pass fallback path (used when h_pre would not fit the VMEM budget).
    hidden2, out2 = autoencoder_forward(x, params, force_two_pass=True)
    jax.block_until_ready((hidden2, out2))
    assert jnp.allclose(hidden2, hidden_gold, atol=5e-4, rtol=5e-4)
    assert jnp.allclose(out2, out_gold, atol=5e-4, rtol=5e-4)

    print("KERNEL_OK")
</pallas_src>

<mosaic_0001>
module attributes {stable_mosaic.version = 11 : i64} {
  func.func @_fused_kernel(%arg0: i32, %arg1: i32, %arg2: i32, %arg3: memref<1x4x256xf32, #tpu.memory_space<vmem>>, %arg4: memref<8x4xf32, #tpu.memory_space<vmem>>, %arg5: memref<8x1xf32, #tpu.memory_space<vmem>>, %arg6: memref<8x1xf32, #tpu.memory_space<vmem>>, %arg7: memref<8x1xf32, #tpu.memory_space<vmem>>, %arg8: memref<4x8xf32, #tpu.memory_space<vmem>>, %arg9: memref<4x1xf32, #tpu.memory_space<vmem>>, %arg10: memref<1x8x256xf32, #tpu.memory_space<vmem>>, %arg11: memref<1x4x256xf32, #tpu.memory_space<vmem>>, %arg12: memref<2x8x256xf32, #tpu.memory_space<vmem>>, %arg13: memref<8x1xf32, #tpu.memory_space<vmem>>, %arg14: memref<8x1xf32, #tpu.memory_space<vmem>>, %arg15: memref<8x1xf32, #tpu.memory_space<vmem>>, %arg16: memref<8x1xf32, #tpu.memory_space<vmem>>) attributes {dimension_semantics = [#tpu.dimension_semantics<arbitrary>, #tpu.dimension_semantics<arbitrary>, #tpu.dimension_semantics<arbitrary>], iteration_bounds = array<i64: 2, 2, 1>, scalar_prefetch = 0 : i64, scratch_operands = 5 : i64, tpu.core_type = #tpu.core_type<tc>, window_params = [{transform_indices = @transform_0, window_bounds = array<i64: 1, 4, 256>}, {pipeline_mode = #tpu.pipeline_mode<synchronous>, transform_indices = @transform_1, window_bounds = array<i64: 8, 4>}, {pipeline_mode = #tpu.pipeline_mode<synchronous>, transform_indices = @transform_2, window_bounds = array<i64: 8, 1>}, {pipeline_mode = #tpu.pipeline_mode<synchronous>, transform_indices = @transform_3, window_bounds = array<i64: 8, 1>}, {pipeline_mode = #tpu.pipeline_mode<synchronous>, transform_indices = @transform_4, window_bounds = array<i64: 8, 1>}, {pipeline_mode = #tpu.pipeline_mode<synchronous>, transform_indices = @transform_5, window_bounds = array<i64: 4, 8>}, {pipeline_mode = #tpu.pipeline_mode<synchronous>, transform_indices = @transform_6, window_bounds = array<i64: 4, 1>}, {transform_indices = @transform_7, window_bounds = array<i64: 1, 8, 256>}, {transform_indices = @transform_8, window_bounds = array<i64: 1, 4, 256>}]} {
    %c1_i32 = arith.constant 1 : i32
    %0 = arith.muli %arg1, %c1_i32 : i32
    %1 = arith.addi %0, %arg2 : i32
    %c0_i32 = arith.constant 0 : i32
    %2 = arith.cmpi eq, %arg0, %c0_i32 : i32
    %3 = arith.extui %2 : i1 to i32
    %c0_i32_0 = arith.constant 0 : i32
    %4 = arith.cmpi ne, %3, %c0_i32_0 : i32
    scf.if %4 {
      %c0_i32_3 = arith.constant 0 : i32
      %8 = arith.cmpi eq, %arg1, %c0_i32_3 : i32
      %c0_i32_4 = arith.constant 0 : i32
      %9 = arith.cmpi eq, %arg2, %c0_i32_4 : i32
      %10 = arith.andi %8, %9 : i1
      %11 = arith.extui %10 : i1 to i32
      %c0_i32_5 = arith.constant 0 : i32
      %12 = arith.cmpi ne, %11, %c0_i32_5 : i32
      scf.if %12 {
        %cst_24 = arith.constant 0.000000e+00 : f32
        %35 = vector.broadcast %cst_24 : f32 to vector<8x1xf32>
        %c0_25 = arith.constant 0 : index
        %c0_26 = arith.constant 0 : index
        %36 = vector.load %arg13[%c0_25, %c0_26] : memref<8x1xf32, #tpu.memory_space<vmem>>, vector<8x1xf32>
        tpu.vector_store %arg13[%c0_25, %c0_26], %35 {strides = array<i32>} : memref<8x1xf32, #tpu.memory_space<vmem>>, vector<8x1xf32>,
        %cst_27 = arith.constant 0.000000e+00 : f32
        %37 = vector.broadcast %cst_27 : f32 to vector<8x1xf32>
        %c0_28 = arith.constant 0 : index
        %c0_29 = arith.constant 0 : index
        %38 = vector.load %arg14[%c0_28, %c0_29] : memref<8x1xf32, #tpu.memory_space<vmem>>, vector<8x1xf32>
        tpu.vector_store %arg14[%c0_28, %c0_29], %37 {strides = array<i32>} : memref<8x1xf32, #tpu.memory_space<vmem>>, vector<8x1xf32>,
      } else {
      }
      %c0 = arith.constant 0 : index
      %c0_6 = arith.constant 0 : index
      %13 = vector.load %arg4[%c0, %c0_6] : memref<8x4xf32, #tpu.memory_space<vmem>>, vector<8x4xf32>
      %c0_7 = arith.constant 0 : index
      %c0_8 = arith.constant 0 : index
      %c0_9 = arith.constant 0 : index
      %14 = vector.load %arg3[%c0_7, %c0_8, %c0_9] : memref<1x4x256xf32, #tpu.memory_space<vmem>>, vector<1x4x256xf32>
      %15 = vector.shape_cast %14 : vector<1x4x256xf32> to vector<4x256xf32>
      %cst = arith.constant dense<0.000000e+00> : vector<8x256xf32>
      %16 = tpu.matmul %13, %15, %cst {dimension_numbers = #tpu.dot_dimension_numbers<[1], [0], [0], [1], [0, 0, 1, 1], [], []>} : vector<8x4xf32>, vector<4x256xf32>, vector<8x256xf32> -> vector<8x256xf32>
      %c0_10 = arith.constant 0 : index
      %c0_11 = arith.constant 0 : index
      %17 = vector.load %arg5[%c0_10, %c0_11] : memref<8x1xf32, #tpu.memory_space<vmem>>, vector<8x1xf32>
      %18 = vector.broadcast %17 : vector<8x1xf32> to vector<8x256xf32>
      %19 = arith.addf %16, %18 : vector<8x256xf32>
      %20 = arith.index_cast %1 : i32 to index
      %c0_12 = arith.constant 0 : index
      %c0_13 = arith.constant 0 : index
      %21 = vector.load %arg12[%20, %c0_12, %c0_13] : memref<2x8x256xf32, #tpu.memory_space<vmem>>, vector<1x8x256xf32>
      %22 = vector.shape_cast %21 : vector<1x8x256xf32> to vector<8x256xf32>
      %23 = vector.shape_cast %19 : vector<8x256xf32> to vector<1x8x256xf32>
      tpu.vector_store %arg12[%20, %c0_12, %c0_13], %23 {strides = array<i32>} : memref<2x8x256xf32, #tpu.memory_space<vmem>>, vector<1x8x256xf32>,
      %c0_14 = arith.constant 0 : index
      %c0_15 = arith.constant 0 : index
      %24 = vector.load %arg13[%c0_14, %c0_15] : memref<8x1xf32, #tpu.memory_space<vmem>>, vector<8x1xf32>
      %cst_16 = arith.constant dense<0.000000e+00> : vector<8xf32>
      %25 = vector.multi_reduction <add>, %19, %cst_16 [1] : vector<8x256xf32> to vector<8xf32>
      %26 = vector.shape_cast %25 : vector<8xf32> to vector<8x1xf32>
      %27 = arith.addf %24, %26 : vector<8x1xf32>
      %c0_17 = arith.constant 0 : index
      %c0_18 = arith.constant 0 : index
      %28 = vector.load %arg13[%c0_17, %c0_18] : memref<8x1xf32, #tpu.memory_space<vmem>>, vector<8x1xf32>
      tpu.vector_store %arg13[%c0_17, %c0_18], %27 {strides = array<i32>} : memref<8x1xf32, #tpu.memory_space<vmem>>, vector<8x1xf32>,
      %c0_19 = arith.constant 0 : index
      %c0_20 = arith.constant 0 : index
      %29 = vector.load %arg14[%c0_19, %c0_20] : memref<8x1xf32, #tpu.memory_space<vmem>>, vector<8x1xf32>
      %30 = arith.mulf %19, %19 : vector<8x256xf32>
      %cst_21 = arith.constant dense<0.000000e+00> : vector<8xf32>
      %31 = vector.multi_reduction <add>, %30, %cst_21 [1] : vector<8x256xf32> to vector<8xf32>
      %32 = vector.shape_cast %31 : vector<8xf32> to vector<8x1xf32>
      %33 = arith.addf %29, %32 : vector<8x1xf32>
      %c0_22 = arith.constant 0 : index
      %c0_23 = arith.constant 0 : index
      %34 = vector.load %arg14[%c0_22, %c0_23] : memref<8x1xf32, #tpu.memory_space<vmem>>, vector<8x1xf32>
      tpu.vector_store %arg14[%c0_22, %c0_23], %33 {strides = array<i32>} : memref<8x1xf32, #tpu.memory_space<vmem>>, vector<8x1xf32>,
    } else {
    }
    %c1_i32_1 = arith.constant 1 : i32
    %5 = arith.cmpi eq, %arg0, %c1_i32_1 : i32
    %6 = arith.extui %5 : i1 to i32
    %c0_i32_2 = arith.constant 0 : i32
    %7 = arith.cmpi ne, %6, %c0_i32_2 : i32
    scf.if %7 {
      %c0_i32_3 = arith.constant 0 : i32
      %8 = arith.cmpi eq, %arg1, %c0_i32_3 : i32
      %c0_i32_4 = arith.constant 0 : i32
      %9 = arith.cmpi eq, %arg2, %c0_i32_4 : i32
      %10 = arith.andi %8, %9 : i1
      %11 = arith.extui %10 : i1 to i32
      %c0_i32_5 = arith.constant 0 : i32
      %12 = arith.cmpi ne, %11, %c0_i32_5 : i32
      scf.if %12 {
        %c0_21 = arith.constant 0 : index
        %c0_22 = arith.constant 0 : index
        %33 = vector.load %arg13[%c0_21, %c0_22] : memref<8x1xf32, #tpu.memory_space<vmem>>, vector<8x1xf32>
        %cst_23 = arith.constant 0.001953125 : f32
        %34 = vector.broadcast %cst_23 : f32 to vector<8x1xf32>
        %35 = arith.mulf %33, %34 : vector<8x1xf32>
        %c0_24 = arith.constant 0 : index
        %c0_25 = arith.constant 0 : index
        %36 = vector.load %arg14[%c0_24, %c0_25] : memref<8x1xf32, #tpu.memory_space<vmem>>, vector<8x1xf32>
        %cst_26 = arith.constant 0.001953125 : f32
        %37 = vector.broadcast %cst_26 : f32 to vector<8x1xf32>
        %38 = arith.mulf %36, %37 : vector<8x1xf32>
        %39 = arith.mulf %35, %35 : vector<8x1xf32>
        %40 = arith.subf %38, %39 : vector<8x1xf32>
        %cst_27 = arith.constant 0.000000e+00 : f32
        %41 = vector.broadcast %cst_27 : f32 to vector<8x1xf32>
        %42 = arith.maximumf %40, %41 : vector<8x1xf32>
        %c0_28 = arith.constant 0 : index
        %c0_29 = arith.constant 0 : index
        %43 = vector.load %arg6[%c0_28, %c0_29] : memref<8x1xf32, #tpu.memory_space<vmem>>, vector<8x1xf32>
        %cst_30 = arith.constant 9.99999974E-6 : f32
        %44 = vector.broadcast %cst_30 : f32 to vector<8x1xf32>
        %45 = arith.addf %42, %44 : vector<8x1xf32>
        %46 = math.rsqrt %45 : vector<8x1xf32>
        %47 = arith.mulf %43, %46 : vector<8x1xf32>
        %c0_31 = arith.constant 0 : index
        %c0_32 = arith.constant 0 : index
        %48 = vector.load %arg15[%c0_31, %c0_32] : memref<8x1xf32, #tpu.memory_space<vmem>>, vector<8x1xf32>
        tpu.vector_store %arg15[%c0_31, %c0_32], %47 {strides = array<i32>} : memref<8x1xf32, #tpu.memory_space<vmem>>, vector<8x1xf32>,
        %c0_33 = arith.constant 0 : index
        %c0_34 = arith.constant 0 : index
        %49 = vector.load %arg7[%c0_33, %c0_34] : memref<8x1xf32, #tpu.memory_space<vmem>>, vector<8x1xf32>
        %50 = arith.mulf %35, %47 : vector<8x1xf32>
        %51 = arith.subf %49, %50 : vector<8x1xf32>
        %c0_35 = arith.constant 0 : index
        %c0_36 = arith.constant 0 : index
        %52 = vector.load %arg16[%c0_35, %c0_36] : memref<8x1xf32, #tpu.memory_space<vmem>>, vector<8x1xf32>
        tpu.vector_store %arg16[%c0_35, %c0_36], %51 {strides = array<i32>} : memref<8x1xf32, #tpu.memory_space<vmem>>, vector<8x1xf32>,
      } else {
      }
      %13 = arith.index_cast %1 : i32 to index
      %c0 = arith.constant 0 : index
      %c0_6 = arith.constant 0 : index
      %14 = vector.load %arg12[%13, %c0, %c0_6] : memref<2x8x256xf32, #tpu.memory_space<vmem>>, vector<1x8x256xf32>
      %15 = vector.shape_cast %14 : vector<1x8x256xf32> to vector<8x256xf32>
      %c0_7 = arith.constant 0 : index
      %c0_8 = arith.constant 0 : index
      %16 = vector.load %arg15[%c0_7, %c0_8] : memref<8x1xf32, #tpu.memory_space<vmem>>, vector<8x1xf32>
      %17 = vector.broadcast %16 : vector<8x1xf32> to vector<8x256xf32>
      %18 = arith.mulf %15, %17 : vector<8x256xf32>
      %c0_9 = arith.constant 0 : index
      %c0_10 = arith.constant 0 : index
      %19 = vector.load %arg16[%c0_9, %c0_10] : memref<8x1xf32, #tpu.memory_space<vmem>>, vector<8x1xf32>
      %20 = vector.broadcast %19 : vector<8x1xf32> to vector<8x256xf32>
      %21 = arith.addf %18, %20 : vector<8x256xf32>
      %c0_11 = arith.constant 0 : index
      %c0_12 = arith.constant 0 : index
      %c0_13 = arith.constant 0 : index
      %22 = vector.load %arg10[%c0_11, %c0_12, %c0_13] : memref<1x8x256xf32, #tpu.memory_space<vmem>>, vector<1x8x256xf32>
      %23 = vector.shape_cast %22 : vector<1x8x256xf32> to vector<8x256xf32>
      %24 = vector.shape_cast %21 : vector<8x256xf32> to vector<1x8x256xf32>
      tpu.vector_store %arg10[%c0_11, %c0_12, %c0_13], %24 {strides = array<i32>} : memref<1x8x256xf32, #tpu.memory_space<vmem>>, vector<1x8x256xf32>,
      %c0_14 = arith.constant 0 : index
      %c0_15 = arith.constant 0 : index
      %25 = vector.load %arg8[%c0_14, %c0_15] : memref<4x8xf32, #tpu.memory_space<vmem>>, vector<4x8xf32>
      %cst = arith.constant dense<0.000000e+00> : vector<4x256xf32>
      %26 = tpu.matmul %25, %21, %cst {dimension_numbers = #tpu.dot_dimension_numbers<[1], [0], [0], [1], [0, 0, 1, 1], [], []>} : vector<4x8xf32>, vector<8x256xf32>, vector<4x256xf32> -> vector<4x256xf32>
      %c0_16 = arith.constant 0 : index
      %c0_17 = arith.constant 0 : index
      %27 = vector.load %arg9[%c0_16, %c0_17] : memref<4x1xf32, #tpu.memory_space<vmem>>, vector<4x1xf32>
      %28 = vector.broadcast %27 : vector<4x1xf32> to vector<4x256xf32>
      %29 = arith.addf %26, %28 : vector<4x256xf32>
      %c0_18 = arith.constant 0 : index
      %c0_19 = arith.constant 0 : index
      %c0_20 = arith.constant 0 : index
      %30 = vector.load %arg11[%c0_18, %c0_19, %c0_20] : memref<1x4x256xf32, #tpu.memory_space<vmem>>, vector<1x4x256xf32>
      %31 = vector.shape_cast %30 : vector<1x4x256xf32> to vector<4x256xf32>
      %32 = vector.shape_cast %29 : vector<4x256xf32> to vector<1x4x256xf32>
      tpu.vector_store %arg11[%c0_18, %c0_19, %c0_20], %32 {strides = array<i32>} : memref<1x4x256xf32, #tpu.memory_space<vmem>>, vector<1x4x256xf32>,
    } else {
    }
    return
  }
  func.func @transform_0(%arg0: i32, %arg1: i32, %arg2: i32) -> (i32, i32, i32) {
    %c1_i32 = arith.constant 1 : i32
    %0 = arith.subi %c1_i32, %arg0 : i32
    %1 = arith.muli %arg1, %0 : i32
    %c1_i32_0 = arith.constant 1 : i32
    %2 = arith.muli %c1_i32_0, %arg0 : i32
    %3 = arith.addi %1, %2 : i32
    %c1_i32_1 = arith.constant 1 : i32
    %4 = arith.subi %c1_i32_1, %arg0 : i32
    %5 = arith.muli %arg2, %4 : i32
    %c0_i32 = arith.constant 0 : i32
    %6 = arith.muli %c0_i32, %arg0 : i32
    %7 = arith.addi %5, %6 : i32
    %c0_i32_2 = arith.constant 0 : i32
    %c0_i32_3 = arith.constant 0 : i32
    return %3, %c0_i32_2, %7 : i32, i32, i32
  }
  func.func @transform_1(%arg0: i32, %arg1: i32, %arg2: i32) -> (i32, i32) {
    %c0_i32 = arith.constant 0 : i32
    %c0_i32_0 = arith.constant 0 : i32
    %c0_i32_1 = arith.constant 0 : i32
    return %c0_i32, %c0_i32_0 : i32, i32
  }
  func.func @transform_2(%arg0: i32, %arg1: i32, %arg2: i32) -> (i32, i32) {
    %c0_i32 = arith.constant 0 : i32
    %c0_i32_0 = arith.constant 0 : i32
    %c0_i32_1 = arith.constant 0 : i32
    return %c0_i32, %c0_i32_0 : i32, i32
  }
  func.func @transform_3(%arg0: i32, %arg1: i32, %arg2: i32) -> (i32, i32) {
    %c0_i32 = arith.constant 0 : i32
    %c0_i32_0 = arith.constant 0 : i32
    %c0_i32_1 = arith.constant 0 : i32
    return %c0_i32, %c0_i32_0 : i32, i32
  }
  func.func @transform_4(%arg0: i32, %arg1: i32, %arg2: i32) -> (i32, i32) {
    %c0_i32 = arith.constant 0 : i32
    %c0_i32_0 = arith.constant 0 : i32
    %c0_i32_1 = arith.constant 0 : i32
    return %c0_i32, %c0_i32_0 : i32, i32
  }
  func.func @transform_5(%arg0: i32, %arg1: i32, %arg2: i32) -> (i32, i32) {
    %c0_i32 = arith.constant 0 : i32
    %c0_i32_0 = arith.constant 0 : i32
    %c0_i32_1 = arith.constant 0 : i32
    return %c0_i32, %c0_i32_0 : i32, i32
  }
  func.func @transform_6(%arg0: i32, %arg1: i32, %arg2: i32) -> (i32, i32) {
    %c0_i32 = arith.constant 0 : i32
    %c0_i32_0 = arith.constant 0 : i32
    %c0_i32_1 = arith.constant 0 : i32
    return %c0_i32, %c0_i32_0 : i32, i32
  }
  func.func @transform_7(%arg0: i32, %arg1: i32, %arg2: i32) -> (i32, i32, i32) {
    %0 = arith.muli %arg1, %arg0 : i32
    %1 = arith.muli %arg2, %arg0 : i32
    %c0_i32 = arith.constant 0 : i32
    %c0_i32_0 = arith.constant 0 : i32
    return %0, %c0_i32, %1 : i32, i32, i32
  }
  func.func @transform_8(%arg0: i32, %arg1: i32, %arg2: i32) -> (i32, i32, i32) {
    %0 = arith.muli %arg1, %arg0 : i32
    %1 = arith.muli %arg2, %arg0 : i32
    %c0_i32 = arith.constant 0 : i32
    %c0_i32_0 = arith.constant 0 : i32
    return %0, %c0_i32, %1 : i32, i32, i32
  }
}

</mosaic_0001>

<bundles_post_ra>
// kernel: _autoencoder_forward.1
= control target key start
LH: loop header
LB: loop body
LE: loop exit
PB: predicated region body
PF: predicated region fallthrough
CT: control target
= control target key end

     0   :  { %s1019_s27 = smov 0   ;;  %s1021_s28 = smov 0   ;;  %s1113_s0 = inlined_call_operand.vmem [shape: f32[2,4,256], index: 0, kind: input, shape index: {}]   ;;  %s1114_s1 = inlined_call_operand.vmem [shape: f32[8,4], index: 1, kind: input, shape index: {}]   ;;  %s1115_s2 = inlined_call_operand.vmem [shape: f32[8,1], index: 2, kind: input, shape index: {}]   ;;  %s1116_s3 = inlined_call_operand.vmem [shape: f32[8,1], index: 3, kind: input, shape index: {}]   ;;  %s1117_s4 = inlined_call_operand.vmem [shape: f32[8,1], index: 4, kind: input, shape index: {}]   ;;  %s1118_s5 = inlined_call_operand.vmem [shape: f32[4,8], index: 5, kind: input, shape index: {}]   ;;  %s1119_s6 = inlined_call_operand.vmem [shape: f32[4,1], index: 6, kind: input, shape index: {}]   ;;  %s1120_s7 = inlined_call_operand.vmem [shape: f32[2,8,256], index: 7, kind: output, shape index: {0}]   ;;  %s1121_s8 = inlined_call_operand.vmem [shape: f32[2,4,256], index: 8, kind: output, shape index: {1}]  }
   0x1   :  { %s1023_s29 = smov 0   ;;  %s1025_s30 = smov 0  }
   0x2   :  { %s1027_s9 = smov 0  }
   0x3 LB: > { %s34_s10 = sadd.s32 1, %s959_s29  ;;  %s38_s11 = sadd.s32 1, %s963_s30  ;;  %s967_s9 = sphi %s1027_s9, %s19_s9   ;;  %s963_s30 = sphi %s1025_s30, %s1125_s30   ;;  %s959_s29 = sphi %s1023_s29, %s1124_s29   ;;  %s955_s28 = sphi %s1021_s28, %s1123_s28   ;;  %s951_s27 = sphi %s1019_s27, %s1122_s27  }
   0x4   : > { %p36_p0 = scmp.ge.s32.totalorder %s34_s10, 2  ;;  %p850_p1 = scmp.ge.s32.totalorder %s967_s9, 1 }
   0x5   : > { %p319_p2 = scmp.lt.s32.totalorder %s967_s9, 5 }
   0x6   : > { %s1127_s10 = smov (%p36_p0, %s34_s10), 0  ;;  %s1129_s11 = smov (!%p36_p0, %s38_s11), %s963_s30 }
   0x7   : > { %p320_p3 = pnand %p850_p1, %p319_p2  ;;  %p40_p4 = scmp.ge.s32.totalorder %s1129_s11, 2 }
   0x8   : > { %s378_s12 = ssub.s32 (!%p320_p3), 1, %s955_s28  ;;  %s396_s13 = smul.u32 (!%p320_p3), %s951_s27, %s955_s28 }
   0x9   : > { %s1131_s11 = smov (%p40_p4, %s1129_s11), 0  ;;  %323 = sbr.rel (%p320_p3) target bundleno = 798 (0x31e), region = 48 }
   0xa   : > { %s379_s14 = smul.u32 (!%p320_p3), %s951_s27, %s378_s12  ;;  %p399_p5 = scmp.lt.s32.totalorder (!%p320_p3), %s396_s13, 1 }
   0xb   : > { %p857_p7 = scmp.ne.s32.totalorder (!%p320_p3), %s955_s28, 0 }
   0xc   : > { %s380_s15 = sadd.s32 (!%p320_p3), %s955_s28, %s379_s14 }
   0xd   : > { %p383_p6 = scmp.lt.s32.totalorder (!%p320_p3), %s380_s15, 1 }
  0x10   : > { %s1133_s13 = smov (!%p399_p5, %s396_s13), 1  ;;  %s1135_s15 = smov (!%p383_p6, %s380_s15), 1 }
  0x11   : > { %s872_s16 = sshll.u32 %s1133_s13, 4  ;;  %s873_s17 = sshll.u32 %s1133_s13, 3 }
  0x12   : > { %s871_s18 = sshll.u32 %s1135_s15, 3  ;;  %s1061_s21 = scalar_lea.vmem %s1120_s7, %s872_s16 }
  0x13   : > { %s390_s24 = scalar_lea.vmem %s1113_s0, %s871_s18  ;;  %s1069_s12 = scalar_lea.vmem %s1121_s8, %s873_s17 }
  0x14   : > { %428 = sbr.rel (%p857_p7) target bundleno = 403 (0x193), region = 52  ;;  %p429_p8 = scmp.eq.s32.totalorder (!%p857_p7), %s951_s27, 0 }
  0x1b   : > { %434 = sbr.rel (!%p429_p8) target bundleno = 34 (0x22), region = 56  ;;  %vm435_vm0 = vcmask (%p429_p8), 7168   ;;  %v969_v0 = vmov (%p429_p8), 0.0  }
  0x1c   : > { %436 = vst.msk [vmem:[#allocation3] sm:$0xff] (%p429_p8), %vm435_vm0, %v969_v0  ;;  %437 = vst.msk [vmem:[#allocation4] sm:$0xff] (%p429_p8), %vm435_vm0, %v969_v0 }
  0x22 PF: > { %v439_v1 = vld [vmem:[%s390_s24] sm:$0xff]  ;;  %vm452_vm1 = vcmask 1043456   ;;  %v970_v3 = vmov 0.0   ;;  %v971_v4 = vmov 0   ;;  %vm448_vm2 = vcmask 31744   ;;  %s875_s17 = sshll.u32 %s951_s27, 4 }
  0x23   : > { %v447_v2 = vcombine.high %v439_v1, %v439_v1  ;;  %521 = vmatprep.mubr.f32.mxu0 %v970_v3  ;;  %923 = vset.pattern.permute.xlu0 %v971_v4  ;;  %v440_v5 = vld [vmem:[%s1115_s2] sm:$0xff]  ;;  %s530_s18 = scalar_lea.vmem [#allocation2], %s875_s17  ;;  %vm538_vm3 = vcmask 7168   ;;  %v540_v18 = vld [vmem:[#allocation4] sm:$0xff] }
  0x24   : > { %v438_v6 = vld [vmem:[%s1114_s1] sm:$0xff]  ;;  %443 = vperm.xlu0 %923, %v440_v5  }
  0x25   : > { %859 = vmatprep.subr.msk.mxu0 %vm452_vm1, %v447_v2  ;;  %v533_v16 = vld [vmem:[#allocation3] sm:$0xff] }
  0x26   : > { %860 = vmatpush1.msk.msra.mxu0 %vm452_vm1, %v439_v1 }
  0x27   : > { %861 = vmatmul.mubr.msk.f32.vlgmr.msra.gmra.mrb[0].mxu0 %vm448_vm2, %v438_v6 }
  0xa3   : > { %v444_v7 = vpop.permute.xlu0 %443 }
  0xfa   : > { %v523_v8 = vpop.f32.mrb[0].mxu0 }
  0xfb   : > { %v524_v9 = vadd.f32 %v523_v8, %v444_v7  ;;  %v525_v10 = vpop.f32.mrb[1].mxu0 }
  0xfc   : > { %v526_v11 = vadd.f32 %v525_v10, %v444_v7 }
  0xfd   : > { %531 = vst [vmem:[%s530_s18] sm:$0xff] %v524_v9  ;;  %v541_v12 = vmul.f32 %v524_v9, %v524_v9 }
  0xfe   : > { %532 = vst [vmem:[%s530_s18 + $0x8] sm:$0xff] %v526_v11  ;;  %v534_v13 = vadd.f32 %v526_v11, %v524_v9  ;;  %v542_v14 = vmul.f32 %v526_v11, %v526_v11 }
 0x100   : > { %535 = vadd.xlane.f32.xlu0 %v534_v13  ;;  %v543_v15 = vadd.f32 %v542_v14, %v541_v12 }
 0x102   : > { %544 = vadd.xlane.f32.xlu1 %v543_v15 }
 0x18d   : > { %v536_v17 = vpop.xlane.xlu0 %535 }
 0x18e   : > { %v537_v19 = vadd.f32 %v536_v17, %v533_v16 }
 0x18f   : > { %v545_v20 = vpop.xlane.xlu1 %544 }
 0x190   : > { %539 = vst.msk [vmem:[#allocation3] sm:$0xff] %vm538_vm3, %v537_v19  ;;  %v546_v21 = vadd.f32 %v545_v20, %v540_v18 }
 0x192   : > { %547 = vst.msk [vmem:[#allocation4] sm:$0xff] %vm538_vm3, %v546_v21 }
 0x193 PF: > { %p864_p9 = scmp.ne.s32.totalorder %s955_s28, 1 }
 0x194   : > { %p552_p10 = scmp.eq.s32.totalorder (!%p864_p9), %s951_s27, 0 }
 0x195   : > { %551 = sbr.rel (%p864_p9) target bundleno = 798 (0x31e), region = 60 }
 0x19c   : > { %557 = sbr.rel (!%p552_p10) target bundleno = 441 (0x1b9), region = 64  ;;  %v558_v22 = vld [vmem:[#allocation3] sm:$0xff] (%p552_p10)  ;;  %v560_v23 = vld [vmem:[#allocation4] sm:$0xff] (%p552_p10)  ;;  %vm569_vm4 = vcmask (%p552_p10), 7168  }
 0x19d   : > { %v559_v24 = vmul.f32 (%p552_p10), 0.001953125, %v558_v22  ;;  %v561_v25 = vmul.f32 (%p552_p10), 0.001953125, %v560_v23  ;;  %v565_v30 = vld [vmem:[%s1116_s3] sm:$0xff] (%p552_p10) }
 0x19e   : > { %v571_v33 = vld [vmem:[%s1117_s4] sm:$0xff] (%p552_p10) }
 0x19f   : > { %v562_v26 = vmul.f32 (%p552_p10), %v559_v24, %v559_v24 }
 0x1a1   : > { %v563_v27 = vsub.f32 (%p552_p10), %v561_v25, %v562_v26 }
 0x1a3   : > { %v564_v28 = vmax.f32 %v563_v27, 0.0 }
 0x1a5   : > { %v566_v29 = vadd.f32 1e-05, %v564_v28 }
 0x1a7   : > { %925 = vrsqrt.f32 %v566_v29 }
 0x1b1   : > { %v926_v31 = vpop.eup %925 }
 0x1b2   : > { %v568_v32 = vmul.f32 %v926_v31, %v565_v30 }
 0x1b4   : > { %570 = vst.msk [vmem:[#allocation5] sm:$0xff] %vm569_vm4, %v568_v32  ;;  %v572_v34 = vmul.f32 %v568_v32, %v559_v24 }
 0x1b6   : > { %v573_v35 = vsub.f32 %v571_v33, %v572_v34 }
 0x1b8   : > { %574 = vst.msk [vmem:[#allocation6] sm:$0xff] %vm569_vm4, %v573_v35 }
 0x1b9 PF: > { %v972_v37 = vmov 0   ;;  %v973_v39 = vmov 0.0   ;;  %v599_v40 = vld [vmem:[%s1119_s6] sm:$0xf]  ;;  %s877_s25 = sshll.u32 %s951_s27, 4  ;;  %vm605_vm5 = vcmask 64512  }
 0x1ba   : > { %927 = vset.pattern.permute.xlu0 %v972_v37  ;;  %928 = vset.pattern.permute.xlu1 %v972_v37  ;;  %s577_s26 = scalar_lea.vmem [#allocation2], %s877_s25  ;;  %v598_v49 = vld [vmem:[%s1118_s5] sm:$0xf] }
 0x1bb   : > { %v580_v36 = vld [vmem:[#allocation5] sm:$0xff]  ;;  %673 = vmatprep.mubr.f32.mxu0 %v973_v39  ;;  %602 = vperm.xlu1 %928, %v599_v40   ;;  %v578_v42 = vld [vmem:[%s577_s26] sm:$0xff]  ;;  %v579_v43 = vld [vmem:[%s577_s26 + $0x8] sm:$0xff] }
 0x1bc   : > { %583 = vperm.xlu0 %927, %v580_v36  }
 0x1bf   : > { %v588_v38 = vld [vmem:[#allocation6] sm:$0xff] }
 0x1c0   : > { %591 = vperm.xlu0 %927, %v588_v38  }
 0x23a   : > { %v603_v50 = vpop.permute.xlu1 %602 }
 0x23b   : > { %v584_v41 = vpop.permute.xlu0 %583 }
 0x23c   : > { %v586_v44 = vmul.f32 %v584_v41, %v578_v42  ;;  %v587_v45 = vmul.f32 %v584_v41, %v579_v43 }
 0x23f   : > { %v592_v46 = vpop.permute.xlu0 %591 }
 0x240   : > { %v594_v47 = vadd.f32 %v592_v46, %v586_v44  ;;  %v595_v48 = vadd.f32 %v592_v46, %v587_v45 }
 0x242   : > { %596 = vst [vmem:[%s1061_s21] sm:$0xff] %v594_v47  ;;  %597 = vst [vmem:[%s1061_s21 + $0x8] sm:$0xff] %v595_v48  ;;  %609 = vmatprep.subr.mxu0 %v595_v48 }
 0x243   : > { %610 = vmatpush1.msra.mxu0 %v594_v47 }
 0x244   : > { %868 = vmatmul.mubr.msk.f32.vlgmr.msra.gmra.mrb[0].mxu0 %vm605_vm5, %v598_v49 }
 0x317   : > { %v675_v51 = vpop.f32.mrb[0].mxu0 }
 0x318   : > { %v676_v52 = vadd.f32 %v675_v51, %v603_v50  ;;  %v677_v53 = vpop.f32.mrb[1].mxu0 }
 0x319   : > { %v678_v54 = vadd.f32 %v677_v53, %v603_v50 }
 0x31b   : > { %v682_v55 = vcombine.low %v676_v52, %v678_v54 }
 0x31d   : > { %684 = vst [vmem:[%s1069_s12] sm:$0xff] %v682_v55 }
 0x31e PF: > { %s19_s9 = sadd.s32 1, %s967_s9   ;;  %s1122_s27 = smov %s959_s29 }
 0x31f   : > { %p16_p11 = scmp.ge.s32.totalorder %s19_s9, 6   ;;  %s1123_s28 = smov %s963_s30 }
 0x320   : > { %s1124_s29 = smov %s1127_s10  ;;  %s1125_s30 = smov %s1131_s11 }
 0x321   :  { %18 = sbr.rel (!%p16_p11) target bundleno = 3 (0x3), region = 108 }

</bundles_post_ra>
